<compile_context>
chip_gen: v7x
topology: tpu7x:2x2x1
jax: 0.10.0
libtpu: 0.0.40
codegen_flags: <defaults>
</compile_context>

<pallas_src>
import jax
import jax.numpy as jnp
from jax import lax
from jax.experimental import pallas as pl
from jax.experimental.pallas import tpu as pltpu


def _make_conv_kernel(N, Cin, Cout, H, W, K, k_pad):
    NHW = N * H * W
    n_rows = Cin * K * K

    def kernel(w_ref, b_ref, x_ref, o_ref, slab_ref):
        # w_ref:    VMEM f32[Cout, k_pad]      weights, column index = tap*Cin + ci
        # b_ref:    VMEM f32[Cout, 1]          bias (broadcast over lanes)
        # x_ref:    VMEM f32[Cin, NHW + pad]   channel-major flattened input
        # o_ref:    VMEM f32[Cout, NHW]        channel-major full-plane output
        # slab_ref: VMEM f32[k_pad, NHW]       im2col slab (tap-major rows)

        # Build the im2col slab with 9 lane-dense shifted copies (one per
        # (kh, kw) tap, Cin rows each).  Each copy is a contiguous, unmasked
        # (Cin, NHW) move; shift offsets are static.
        for kh in range(K):
            for kw in range(K):
                tap = kh * K + kw
                shift = kh * W + kw
                slab_ref[pl.ds(tap * Cin, Cin), :] = x_ref[:, pl.ds(shift, NHW)]

        # Zero the contraction-padding rows (zero weight * NaN garbage = NaN).
        if k_pad > n_rows:
            slab_ref[pl.ds(n_rows, k_pad - n_rows), :] = jnp.zeros(
                (k_pad - n_rows, NHW), jnp.float32)

        # Single MXU pass: (Cout, k_pad) @ (k_pad, NHW) -> (Cout, NHW),
        # then a lane-dense bias add and one contiguous store.
        acc = jnp.dot(w_ref[...], slab_ref[...],
                      preferred_element_type=jnp.float32)
        o_ref[...] = acc + b_ref[...]

    return kernel


def conv2d_pallas(x, w, b):
    """VALID conv. x: (N, Cin, H, W) f32, w: (Cout, Cin, K, K) f32, b: (Cout,) f32."""
    N, Cin, H, W = x.shape
    Cout, _, K, _ = w.shape
    OH, OW = H - K + 1, W - K + 1
    NHW = N * H * W
    n_rows = Cin * K * K
    k_pad = ((n_rows + 7) // 8) * 8                  # 27 -> 32
    max_shift = (K - 1) * W + (K - 1)                # 34
    lane_pad = ((max_shift + 127) // 128) * 128      # 128

    # ---- wrapper-side layout plumbing (reshape / transpose / zero-pad) ----
    # input  -> channel-major, lane-dense rows of length N*H*W (+ shift pad)
    x_cf = jnp.transpose(x, (1, 0, 2, 3)).reshape(Cin, NHW)
    x_cf = jnp.pad(x_cf, ((0, 0), (0, lane_pad)))
    # weights -> (Cout, tap*Cin + ci), zero-padded to k_pad columns
    w_mat = jnp.transpose(w, (0, 2, 3, 1)).reshape(Cout, n_rows)
    w_mat = jnp.pad(w_mat, ((0, 0), (0, k_pad - n_rows)))
    b_col = b.reshape(Cout, 1)

    kernel = _make_conv_kernel(N, Cin, Cout, H, W, K, k_pad)

    out_full = pl.pallas_call(
        kernel,
        out_shape=jax.ShapeDtypeStruct((Cout, NHW), jnp.float32),
        in_specs=[
            pl.BlockSpec(memory_space=pltpu.MemorySpace.VMEM),  # weight tile
            pl.BlockSpec(memory_space=pltpu.MemorySpace.VMEM),  # bias column
            pl.BlockSpec(memory_space=pltpu.MemorySpace.VMEM),  # input slab
        ],
        out_specs=pl.BlockSpec(memory_space=pltpu.MemorySpace.VMEM),
        scratch_shapes=[pltpu.VMEM((k_pad, NHW), jnp.float32)],
    )(w_mat, b_col, x_cf)

    # Back to NCHW and crop the VALID output window (pure layout plumbing).
    out = out_full.reshape(Cout, N, H, W)[:, :, :OH, :OW]
    return jnp.transpose(out, (1, 0, 2, 3))


def init_params(key):
    """Deterministic Conv2d(3, 16, 3) params, PyTorch-style uniform init."""
    wkey, bkey = jax.random.split(key)
    fan_in = 3 * 3 * 3
    bound = 1.0 / jnp.sqrt(float(fan_in))
    w = jax.random.uniform(wkey, (16, 3, 3, 3), jnp.float32, -bound, bound)
    b = jax.random.uniform(bkey, (16,), jnp.float32, -bound, bound)
    return w, b


@jax.jit
def testblock2_forward(x, w, b):
    return conv2d_pallas(x, w, b)


def reference_forward(x, w, b):
    out = lax.conv_general_dilated(
        x, w, window_strides=(1, 1), padding="VALID",
        dimension_numbers=("NCHW", "OIHW", "NCHW"))
    return out + b.reshape(1, -1, 1, 1)


if __name__ == "__main__":
    key = jax.random.PRNGKey(0)
    xkey, pkey = jax.random.split(key)

    # Input: N=2, C=3, H=W=16  ->  output (2, 16, 14, 14)
    x = jax.random.normal(xkey, (2, 3, 16, 16), jnp.float32)
    w, b = init_params(pkey)

    out = testblock2_forward(x, w, b)
    out = jax.block_until_ready(out)

    assert out.shape == (2, 16, 14, 14), out.shape

    ref = jax.block_until_ready(reference_forward(x, w, b))
    assert jnp.allclose(out, ref, atol=1e-4, rtol=1e-4), (
        float(jnp.max(jnp.abs(out - ref))))

    print("KERNEL_OK")
</pallas_src>

<mosaic_0001>
module attributes {stable_mosaic.version = 11 : i64} {
  func.func @kernel(%arg0: memref<16x32xf32, #tpu.memory_space<vmem>>, %arg1: memref<16x1xf32, #tpu.memory_space<vmem>>, %arg2: memref<3x640xf32, #tpu.memory_space<vmem>>, %arg3: memref<16x512xf32, #tpu.memory_space<vmem>>, %arg4: memref<32x512xf32, #tpu.memory_space<vmem>>) attributes {dimension_semantics = [], scalar_prefetch = 0 : i64, scratch_operands = 1 : i64, tpu.core_type = #tpu.core_type<tc>} {
    %c0 = arith.constant 0 : index
    %c0_0 = arith.constant 0 : index
    %0 = vector.load %arg2[%c0, %c0_0] : memref<3x640xf32, #tpu.memory_space<vmem>>, vector<3x512xf32>
    %c0_1 = arith.constant 0 : index
    %c0_2 = arith.constant 0 : index
    %1 = vector.load %arg4[%c0_1, %c0_2] : memref<32x512xf32, #tpu.memory_space<vmem>>, vector<3x512xf32>
    tpu.vector_store %arg4[%c0_1, %c0_2], %0 {strides = array<i32>} : memref<32x512xf32, #tpu.memory_space<vmem>>, vector<3x512xf32>,
    %c0_3 = arith.constant 0 : index
    %c1 = arith.constant 1 : index
    %2 = vector.load %arg2[%c0_3, %c1] : memref<3x640xf32, #tpu.memory_space<vmem>>, vector<3x512xf32>
    %c3 = arith.constant 3 : index
    %c0_4 = arith.constant 0 : index
    %3 = vector.load %arg4[%c3, %c0_4] : memref<32x512xf32, #tpu.memory_space<vmem>>, vector<3x512xf32>
    tpu.vector_store %arg4[%c3, %c0_4], %2 {strides = array<i32>} : memref<32x512xf32, #tpu.memory_space<vmem>>, vector<3x512xf32>,
    %c0_5 = arith.constant 0 : index
    %c2 = arith.constant 2 : index
    %4 = vector.load %arg2[%c0_5, %c2] : memref<3x640xf32, #tpu.memory_space<vmem>>, vector<3x512xf32>
    %c6 = arith.constant 6 : index
    %c0_6 = arith.constant 0 : index
    %5 = vector.load %arg4[%c6, %c0_6] : memref<32x512xf32, #tpu.memory_space<vmem>>, vector<3x512xf32>
    tpu.vector_store %arg4[%c6, %c0_6], %4 {strides = array<i32>} : memref<32x512xf32, #tpu.memory_space<vmem>>, vector<3x512xf32>,
    %c0_7 = arith.constant 0 : index
    %c16 = arith.constant 16 : index
    %6 = vector.load %arg2[%c0_7, %c16] : memref<3x640xf32, #tpu.memory_space<vmem>>, vector<3x512xf32>
    %c9 = arith.constant 9 : index
    %c0_8 = arith.constant 0 : index
    %7 = vector.load %arg4[%c9, %c0_8] : memref<32x512xf32, #tpu.memory_space<vmem>>, vector<3x512xf32>
    tpu.vector_store %arg4[%c9, %c0_8], %6 {strides = array<i32>} : memref<32x512xf32, #tpu.memory_space<vmem>>, vector<3x512xf32>,
    %c0_9 = arith.constant 0 : index
    %c17 = arith.constant 17 : index
    %8 = vector.load %arg2[%c0_9, %c17] : memref<3x640xf32, #tpu.memory_space<vmem>>, vector<3x512xf32>
    %c12 = arith.constant 12 : index
    %c0_10 = arith.constant 0 : index
    %9 = vector.load %arg4[%c12, %c0_10] : memref<32x512xf32, #tpu.memory_space<vmem>>, vector<3x512xf32>
    tpu.vector_store %arg4[%c12, %c0_10], %8 {strides = array<i32>} : memref<32x512xf32, #tpu.memory_space<vmem>>, vector<3x512xf32>,
    %c0_11 = arith.constant 0 : index
    %c18 = arith.constant 18 : index
    %10 = vector.load %arg2[%c0_11, %c18] : memref<3x640xf32, #tpu.memory_space<vmem>>, vector<3x512xf32>
    %c15 = arith.constant 15 : index
    %c0_12 = arith.constant 0 : index
    %11 = vector.load %arg4[%c15, %c0_12] : memref<32x512xf32, #tpu.memory_space<vmem>>, vector<3x512xf32>
    tpu.vector_store %arg4[%c15, %c0_12], %10 {strides = array<i32>} : memref<32x512xf32, #tpu.memory_space<vmem>>, vector<3x512xf32>,
    %c0_13 = arith.constant 0 : index
    %c32 = arith.constant 32 : index
    %12 = vector.load %arg2[%c0_13, %c32] : memref<3x640xf32, #tpu.memory_space<vmem>>, vector<3x512xf32>
    %c18_14 = arith.constant 18 : index
    %c0_15 = arith.constant 0 : index
    %13 = vector.load %arg4[%c18_14, %c0_15] : memref<32x512xf32, #tpu.memory_space<vmem>>, vector<3x512xf32>
    tpu.vector_store %arg4[%c18_14, %c0_15], %12 {strides = array<i32>} : memref<32x512xf32, #tpu.memory_space<vmem>>, vector<3x512xf32>,
    %c0_16 = arith.constant 0 : index
    %c33 = arith.constant 33 : index
    %14 = vector.load %arg2[%c0_16, %c33] : memref<3x640xf32, #tpu.memory_space<vmem>>, vector<3x512xf32>
    %c21 = arith.constant 21 : index
    %c0_17 = arith.constant 0 : index
    %15 = vector.load %arg4[%c21, %c0_17] : memref<32x512xf32, #tpu.memory_space<vmem>>, vector<3x512xf32>
    tpu.vector_store %arg4[%c21, %c0_17], %14 {strides = array<i32>} : memref<32x512xf32, #tpu.memory_space<vmem>>, vector<3x512xf32>,
    %c0_18 = arith.constant 0 : index
    %c34 = arith.constant 34 : index
    %16 = vector.load %arg2[%c0_18, %c34] : memref<3x640xf32, #tpu.memory_space<vmem>>, vector<3x512xf32>
    %c24 = arith.constant 24 : index
    %c0_19 = arith.constant 0 : index
    %17 = vector.load %arg4[%c24, %c0_19] : memref<32x512xf32, #tpu.memory_space<vmem>>, vector<3x512xf32>
    tpu.vector_store %arg4[%c24, %c0_19], %16 {strides = array<i32>} : memref<32x512xf32, #tpu.memory_space<vmem>>, vector<3x512xf32>,
    %cst = arith.constant 0.000000e+00 : f32
    %18 = vector.broadcast %cst : f32 to vector<5x512xf32>
    %c27 = arith.constant 27 : index
    %c0_20 = arith.constant 0 : index
    %19 = vector.load %arg4[%c27, %c0_20] : memref<32x512xf32, #tpu.memory_space<vmem>>, vector<5x512xf32>
    tpu.vector_store %arg4[%c27, %c0_20], %18 {strides = array<i32>} : memref<32x512xf32, #tpu.memory_space<vmem>>, vector<5x512xf32>,
    %c0_21 = arith.constant 0 : index
    %c0_22 = arith.constant 0 : index
    %20 = vector.load %arg0[%c0_21, %c0_22] : memref<16x32xf32, #tpu.memory_space<vmem>>, vector<16x32xf32>
    %c0_23 = arith.constant 0 : index
    %c0_24 = arith.constant 0 : index
    %21 = vector.load %arg4[%c0_23, %c0_24] : memref<32x512xf32, #tpu.memory_space<vmem>>, vector<32x512xf32>
    %cst_25 = arith.constant dense<0.000000e+00> : vector<16x512xf32>
    %22 = tpu.matmul %20, %21, %cst_25 {dimension_numbers = #tpu.dot_dimension_numbers<[1], [0], [0], [1], [0, 0, 1, 1], [], []>} : vector<16x32xf32>, vector<32x512xf32>, vector<16x512xf32> -> vector<16x512xf32>
    %c0_26 = arith.constant 0 : index
    %c0_27 = arith.constant 0 : index
    %23 = vector.load %arg1[%c0_26, %c0_27] : memref<16x1xf32, #tpu.memory_space<vmem>>, vector<16x1xf32>
    %24 = vector.broadcast %23 : vector<16x1xf32> to vector<16x512xf32>
    %25 = arith.addf %22, %24 : vector<16x512xf32>
    %c0_28 = arith.constant 0 : index
    %c0_29 = arith.constant 0 : index
    %26 = vector.load %arg3[%c0_28, %c0_29] : memref<16x512xf32, #tpu.memory_space<vmem>>, vector<16x512xf32>
    tpu.vector_store %arg3[%c0_28, %c0_29], %25 {strides = array<i32>} : memref<16x512xf32, #tpu.memory_space<vmem>>, vector<16x512xf32>,
    return
  }
}

</mosaic_0001>

<bundles_post_ra>
// kernel: testblock2_forward.1
= control target key start
LH: loop header
LB: loop body
LE: loop exit
PB: predicated region body
PF: predicated region fallthrough
CT: control target
= control target key end

     0   :  { %s571_s20 = smov 127   ;;  %s572_s27 = smov 126   ;;  %vm49_vm0 = vcmask 1039360   ;;  %vm85_vm1 = vcmask 1031168   ;;  %vm125_vm2 = vcmask 916480   ;;  %vm157_vm3 = vcmask 908288   ;;  %s786_s2 = inlined_call_operand.vmem [shape: f32[3,640], index: 2, kind: input, shape index: {}]   ;;  %s787_s1 = inlined_call_operand.vmem [shape: f32[16,1], index: 1, kind: input, shape index: {}]   ;;  %s788_s0 = inlined_call_operand.vmem [shape: f32[16,32], index: 0, kind: input, shape index: {}]   ;;  %s789_s3 = inlined_call_operand.vmem [shape: f32[16,512], index: 3, kind: output, shape index: {}]  }
   0x1   :  { %v28_v0 = vld [vmem:[%s786_s2 + $0x10] sm:$0x7]  ;;  %v27_v1 = vld [vmem:[%s786_s2 + $0x8] sm:$0x77]  ;;  %v610_v2 = vld [vmem:[%s786_s2] sm:$0x77] }
   0x2   :  { %v38_v3 = vrot.slane %v28_v0, 5  ;;  %v36_v4 = vrot.slane %v27_v1, 5  ;;  %v33_v5 = vcombine.high %v27_v1, %v27_v1  ;;  %v32_v6 = vcombine.high %v610_v2, %v610_v2  ;;  %v617_v7 = vld [vmem:[%s786_s2] sm:$0x77]  ;;  %v63_v11 = vld [vmem:[%s786_s2 + $0x8] sm:$0x77] }
   0x3   :  { %v68_v10 = vcombine.high %v617_v7, %v617_v7  ;;  %v72_v12 = vrot.slane %v63_v11, 2  ;;  %v69_v14 = vcombine.high %v63_v11, %v63_v11  ;;  %v64_v15 = vld [vmem:[%s786_s2 + $0x10] sm:$0x7]  ;;  %v102_v16 = vld [vmem:[%s786_s2] sm:$0x77]  ;;  %s573_s9 = smov 112  }
   0x4   :  { %47 = vrot.lane.b32.xlu1 %v38_v3, %s571_s20  ;;  %43 = vrot.lane.b32.xlu0 %v36_v4, %s571_s20  ;;  %v37_v8 = vrot.slane %v33_v5, 5  ;;  %v35_v9 = vrot.slane %v32_v6, 5  ;;  %v74_v17 = vrot.slane %v64_v15, 2  ;;  %v108_v19 = vcombine.high %v102_v16, %v102_v16  ;;  %v103_v20 = vld [vmem:[%s786_s2 + $0x8] sm:$0x77]  ;;  %s574_s16 = smov 111  }
   0x5   :  { %v71_v13 = vrot.slane %v68_v10, 2  ;;  %v73_v18 = vrot.slane %v69_v14, 2  ;;  %v112_v21 = vrot.slane %v103_v20, 7  ;;  %v109_v23 = vcombine.high %v103_v20, %v103_v20  ;;  %v14_v24 = vld [vmem:[%s786_s2] sm:$0x77]  ;;  %s575_s24 = smov 110  }
   0x6   :  { %v111_v22 = vrot.slane %v108_v19, 7  ;;  %v15_v25 = vld [vmem:[%s786_s2 + $0x8] sm:$0x77]  ;;  %v104_v26 = vld [vmem:[%s786_s2 + $0x10] sm:$0x7]  ;;  %v18_v27 = vcombine.high %v14_v24, %v14_v24  ;;  %v70_v44 = vrot.slane %v617_v7, 2 }
   0x7   :  { %22 = vst [vmem:[#allocation2] sm:$0x7] %v14_v24  ;;  %v19_v28 = vcombine.high %v15_v25, %v15_v25  ;;  %24 = vst [vmem:[#allocation2 + $0x10] sm:$0x7] %v15_v25  ;;  %v114_v29 = vrot.slane %v104_v26, 7  ;;  %v113_v30 = vrot.slane %v109_v23, 7 }
   0x8   :  { %45 = vrot.lane.b32.xlu1 %v37_v8, %s571_s20  ;;  %41 = vrot.lane.b32.xlu0 %v35_v9, %s571_s20  ;;  %23 = vst [vmem:[#allocation2 + $0x8] sm:$0x7] %v18_v27  ;;  %v139_v31 = vld [vmem:[%s786_s2 + $0x8] sm:$0x77]  ;;  %v138_v33 = vld [vmem:[%s786_s2] sm:$0x77] }
   0x9   :  { %25 = vst [vmem:[#allocation2 + $0x18] sm:$0x7] %v19_v28  ;;  %v145_v32 = vcombine.low %v139_v31, %v139_v31  ;;  %v170_v34 = vld [vmem:[%s786_s2] sm:$0x77]  ;;  %v171_v37 = vld [vmem:[%s786_s2 + $0x8] sm:$0x77]  ;;  %v144_v47 = vcombine.low %v138_v33, %v138_v33 }
   0xa   :  { %v560_v35 = vld [vmem:[%s786_s2 + $0x10] ss:$0 sps:$4 sm:$0x77]   ;;  %v176_v36 = vcombine.high %v170_v34, %v170_v34  ;;  %v180_v38 = vrot.slane %v171_v37, 1  ;;  %v177_v40 = vcombine.high %v171_v37, %v171_v37  ;;  %v34_v45 = vrot.slane %v610_v2, 5  ;;  %s576_s5 = smov 96  }
   0xb   :  { %v172_v41 = vld [vmem:[%s786_s2 + $0x10] sm:$0x7]  ;;  %v210_v46 = vld [vmem:[%s786_s2] sm:$0x77]  ;;  %v110_v48 = vrot.slane %v102_v16, 7  ;;  %v178_v52 = vrot.slane %v170_v34, 1 }
   0xc   :  { %79 = vrot.lane.b32.xlu1 %v72_v12, %s572_s27  ;;  %77 = vrot.lane.b32.xlu0 %v71_v13, %s572_s27  ;;  %v179_v39 = vrot.slane %v176_v36, 1  ;;  %v182_v42 = vrot.slane %v172_v41, 1  ;;  %v181_v43 = vrot.slane %v177_v40, 1  ;;  %v216_v49 = vcombine.high %v210_v46, %v210_v46  ;;  %v211_v50 = vld [vmem:[%s786_s2 + $0x8] sm:$0x77]  ;;  %s577_s8 = smov 95  }
   0xd   :  { %v217_v53 = vcombine.high %v211_v50, %v211_v50  ;;  %v246_v54 = vld [vmem:[%s786_s2] sm:$0x77]  ;;  %v220_v56 = vrot.slane %v211_v50, 6  ;;  %v212_v58 = vld [vmem:[%s786_s2 + $0x10] sm:$0x7]  ;;  %v578_v1 = vmov 0.0  }
   0xe   :  { %v219_v51 = vrot.slane %v216_v49, 6  ;;  %v252_v57 = vcombine.high %v246_v54, %v246_v54  ;;  %v247_v59 = vld [vmem:[%s786_s2 + $0x8] sm:$0x77]  ;;  %v222_v61 = vrot.slane %v212_v58, 6  ;;  %314 = vst [vmem:[#allocation2 + $0x68] sm:$0xf8] %v578_v1  ;;  %495 = vmatprep.mubr.f32.mxu1 %v578_v1  ;;  %418 = vmatprep.mubr.f32.mxu0 %v578_v1 }
   0xf   :  { %v221_v55 = vrot.slane %v217_v53, 6  ;;  %v253_v62 = vcombine.high %v247_v59, %v247_v59  ;;  %v256_v0 = vrot.slane %v247_v59, 3  ;;  %313 = vst [vmem:[#allocation2 + $0x60] sm:$0xf8] %v578_v1  ;;  %315 = vst [vmem:[#allocation2 + $0x70] sm:$0xf8] %v578_v1 }
  0x10   :  { %83 = vrot.lane.b32.xlu1 %v74_v17, %s572_s27  ;;  %81 = vrot.lane.b32.xlu0 %v73_v18, %s572_s27  ;;  %v255_v60 = vrot.slane %v252_v57, 3  ;;  %316 = vst [vmem:[#allocation2 + $0x78] sm:$0xf8] %v578_v1  ;;  %v282_v2 = vld [vmem:[%s786_s2] sm:$0x77]  ;;  %s579_s15 = smov 94  }
  0x11   :  { %v257_v63 = vrot.slane %v253_v62, 3  ;;  %v248_v3 = vld [vmem:[%s786_s2 + $0x10] sm:$0x7]  ;;  %v288_v4 = vcombine.high %v282_v2, %v282_v2  ;;  %v283_v6 = vld [vmem:[%s786_s2 + $0x8] sm:$0x77]  ;;  %v218_v8 = vrot.slane %v210_v46, 6 }
  0x12   :  { %v258_v5 = vrot.slane %v248_v3, 3  ;;  %v289_v7 = vcombine.high %v283_v6, %v283_v6  ;;  %v284_v9 = vld [vmem:[%s786_s2 + $0x10] sm:$0x7]  ;;  %v254_v10 = vrot.slane %v246_v54, 3  ;;  %v580_v11 = vmov 0   ;;  %v335_v12 = vld [vmem:[%s787_s1] sm:$0xff] }
  0x13   :  { %550 = vset.pattern.permute.xlu0 %v580_v11  ;;  %551 = vset.pattern.permute.xlu1 %v580_v11  ;;  %v336_v13 = vld [vmem:[%s787_s1 + $0x8] sm:$0xff]  ;;  %vm193_vm4 = vcmask 900096   ;;  %vm233_vm5 = vcmask 785408   ;;  %vm269_vm6 = vcmask 777216   ;;  %vm300_vm7 = vcmask 769024  }
  0x14   :  { %119 = vrot.lane.b32.xlu1 %v112_v21, %s573_s9  ;;  %117 = vrot.lane.b32.xlu0 %v111_v22, %s573_s9  ;;  %vm347_vm8 = vcmask 261120  }
  0x18   :  { %123 = vrot.lane.b32.xlu1 %v114_v29, %s573_s9  ;;  %121 = vrot.lane.b32.xlu0 %v113_v30, %s573_s9 }
  0x1c   :  { %151 = vrot.lane.b32.xlu1 %v145_v32, %s574_s16  ;;  %149 = vrot.lane.b32.xlu0 %v138_v33, %s574_s16 }
  0x20   :  { %155 = vrot.lane.b32.xlu1 %v560_v35, %s574_s16  ;;  %153 = vrot.lane.b32.xlu0 %v139_v31, %s574_s16 }
  0x24   :  { %187 = vrot.lane.b32.xlu1 %v180_v38, %s575_s24  ;;  %185 = vrot.lane.b32.xlu0 %v179_v39, %s575_s24 }
  0x28   :  { %191 = vrot.lane.b32.xlu1 %v182_v42, %s575_s24  ;;  %189 = vrot.lane.b32.xlu0 %v181_v43, %s575_s24 }
  0x2c   :  { %75 = vrot.lane.b32.xlu1 %v70_v44, %s572_s27  ;;  %39 = vrot.lane.b32.xlu0 %v34_v45, %s571_s20 }
  0x30   :  { %147 = vrot.lane.b32.xlu1 %v144_v47, %s574_s16  ;;  %115 = vrot.lane.b32.xlu0 %v110_v48, %s573_s9 }
  0x34   :  { %225 = vrot.lane.b32.xlu1 %v219_v51, %s576_s5  ;;  %183 = vrot.lane.b32.xlu0 %v178_v52, %s575_s24 }
  0x38   :  { %229 = vrot.lane.b32.xlu1 %v221_v55, %s576_s5  ;;  %227 = vrot.lane.b32.xlu0 %v220_v56, %s576_s5 }
  0x3c   :  { %261 = vrot.lane.b32.xlu1 %v255_v60, %s577_s8  ;;  %231 = vrot.lane.b32.xlu0 %v222_v61, %s576_s5 }
  0x40   :  { %265 = vrot.lane.b32.xlu1 %v257_v63, %s577_s8  ;;  %263 = vrot.lane.b32.xlu0 %v256_v0, %s577_s8 }
  0x44   :  { %292 = vrot.lane.b32.xlu1 %v288_v4, %s579_s15  ;;  %267 = vrot.lane.b32.xlu0 %v258_v5, %s577_s8 }
  0x48   :  { %296 = vrot.lane.b32.xlu1 %v289_v7, %s579_s15  ;;  %294 = vrot.lane.b32.xlu0 %v283_v6, %s579_s15 }
  0x4c   :  { %223 = vrot.lane.b32.xlu1 %v218_v8, %s576_s5  ;;  %298 = vrot.lane.b32.xlu0 %v284_v9, %s579_s15 }
  0x50   :  { %290 = vrot.lane.b32.xlu1 %v282_v2, %s579_s15  ;;  %259 = vrot.lane.b32.xlu0 %v254_v10, %s577_s8 }
  0x54   :  { %339 = vperm.xlu0 %550, %v335_v12   ;;  %344 = vperm.xlu1 %551, %v336_v13  }
  0x76   :  { %v48_v14 = vpop.permute.xlu1 %47  ;;  %v44_v15 = vpop.permute.xlu0 %43 }
  0x7a   :  { %v46_v16 = vpop.permute.xlu1 %45  ;;  %v42_v17 = vpop.permute.xlu0 %41 }
  0x7b   :  { %v52_v18 = vsel %vm49_vm0, %v44_v15, %v46_v16  ;;  %v53_v19 = vsel %vm49_vm0, %v46_v16, %v48_v14  ;;  %v51_v20 = vsel %vm49_vm0, %v42_v17, %v44_v15 }
  0x7c   :  { %60 = vst [vmem:[#allocation2 + $0x10] sm:$0x38] %v52_v18  ;;  %61 = vst [vmem:[#allocation2 + $0x18] sm:$0x38] %v53_v19 }
  0x7d   :  { %59 = vst [vmem:[#allocation2 + $0x8] sm:$0x38] %v51_v20 }
  0x7e   :  { %v80_v21 = vpop.permute.xlu1 %79  ;;  %v78_v22 = vpop.permute.xlu0 %77 }
  0x7f   :  { %v87_v23 = vsel %vm85_vm1, %v78_v22, %v80_v21 }
  0x80   :  { %95 = vst [vmem:[#allocation2 + $0x28] ss:$-28 sps:$4 sm:$0xc1] %v87_v23  }
  0x82   :  { %v84_v24 = vpop.permute.xlu1 %83  ;;  %v82_v25 = vpop.permute.xlu0 %81 }
  0x83   :  { %v88_v26 = vsel %vm85_vm1, %v80_v21, %v82_v25  ;;  %v89_v27 = vsel %vm85_vm1, %v82_v25, %v84_v24 }
  0x84   :  { %96 = vst [vmem:[#allocation2 + $0x30] ss:$-28 sps:$4 sm:$0xc1] %v88_v26   ;;  %97 = vst [vmem:[#allocation2 + $0x38] ss:$-28 sps:$4 sm:$0xc1] %v89_v27  }
  0x86   :  { %v120_v28 = vpop.permute.xlu1 %119  ;;  %v118_v29 = vpop.permute.xlu0 %117 }
  0x87   :  { %v127_v30 = vsel %vm125_vm2, %v118_v29, %v120_v28  ;;  %v320_v53 = vld [vmem:[#allocation2 + $0x8] sm:$0xff] }
  0x88   :  { %135 = vst [vmem:[#allocation2 + $0x28] sm:$0xe] %v127_v30 }
  0x8a   :  { %v124_v31 = vpop.permute.xlu1 %123  ;;  %v122_v32 = vpop.permute.xlu0 %121 }
  0x8b   :  { %v128_v33 = vsel %vm125_vm2, %v120_v28, %v122_v32  ;;  %v129_v34 = vsel %vm125_vm2, %v122_v32, %v124_v31  ;;  %v322_v58 = vld [vmem:[#allocation2 + $0x18] sm:$0xff]  ;;  %v321_v62 = vld [vmem:[#allocation2 + $0x10] sm:$0xff] }
  0x8c   :  { %136 = vst [vmem:[#allocation2 + $0x30] sm:$0xe] %v128_v33  ;;  %137 = vst [vmem:[#allocation2 + $0x38] sm:$0xe] %v129_v34 }
  0x8e   :  { %v152_v35 = vpop.permute.xlu1 %151  ;;  %v150_v36 = vpop.permute.xlu0 %149 }
  0x8f   :  { %v159_v37 = vsel %vm157_vm3, %v150_v36, %v152_v35 }
  0x90   :  { %167 = vst [vmem:[#allocation2 + $0x28] sm:$0x70] %v159_v37 }
  0x92   :  { %v156_v38 = vpop.permute.xlu1 %155  ;;  %v154_v39 = vpop.permute.xlu0 %153 }
  0x93   :  { %v160_v40 = vsel %vm157_vm3, %v152_v35, %v154_v39  ;;  %v161_v41 = vsel %vm157_vm3, %v154_v39, %v156_v38 }
  0x94   :  { %168 = vst [vmem:[#allocation2 + $0x30] sm:$0x70] %v160_v40  ;;  %169 = vst [vmem:[#allocation2 + $0x38] sm:$0x70] %v161_v41 }
  0x96   :  { %v188_v42 = vpop.permute.xlu1 %187  ;;  %v186_v43 = vpop.permute.xlu0 %185 }
  0x97   :  { %v195_v44 = vsel %vm193_vm4, %v186_v43, %v188_v42 }
  0x98   :  { %203 = vst [vmem:[#allocation2 + $0x48] ss:$-28 sps:$4 sm:$0x83] %v195_v44  }
  0x9a   :  { %v192_v45 = vpop.permute.xlu1 %191  ;;  %v190_v46 = vpop.permute.xlu0 %189 }
  0x9b   :  { %v196_v47 = vsel %vm193_vm4, %v188_v42, %v190_v46  ;;  %v197_v48 = vsel %vm193_vm4, %v190_v46, %v192_v45  ;;  %v317_v46 = vld [vmem:[%s788_s0] sm:$0xff] }
  0x9c   :  { %204 = vst [vmem:[#allocation2 + $0x50] ss:$-28 sps:$4 sm:$0x83] %v196_v47   ;;  %205 = vst [vmem:[#allocation2 + $0x58] ss:$-28 sps:$4 sm:$0x83] %v197_v48  }
  0x9d   :  { %v318_v48 = vld [vmem:[%s788_s0 + $0x8] sm:$0xff] }
  0x9e   :  { %v76_v49 = vpop.permute.xlu1 %75  ;;  %v40_v50 = vpop.permute.xlu0 %39 }
  0x9f   :  { %v86_v51 = vsel %vm85_vm1, %v76_v49, %v78_v22  ;;  %v50_v52 = vsel %vm49_vm0, %v40_v50, %v42_v17  ;;  %v324_v54 = vld [vmem:[#allocation2 + $0x28] sm:$0xff] }
  0xa0   :  { %94 = vst [vmem:[#allocation2 + $0x20] ss:$-28 sps:$4 sm:$0xc1] %v86_v51   ;;  %58 = vst [vmem:[#allocation2] sm:$0x38] %v50_v52  ;;  %v524_v55 = vpack.c.bf16 %v324_v54, %v320_v53 }
  0xa2   :  { %v148_v56 = vpop.permute.xlu1 %147  ;;  %v116_v57 = vpop.permute.xlu0 %115  ;;  %525 = vmatprep.subr.bf16.mxu0 %v524_v55 }
  0xa3   :  { %v158_v59 = vsel %vm157_vm3, %v148_v56, %v150_v36  ;;  %v126_v60 = vsel %vm125_vm2, %v116_v57, %v118_v29  ;;  %v326_v61 = vld [vmem:[#allocation2 + $0x38] sm:$0xff]  ;;  %v325_v63 = vld [vmem:[#allocation2 + $0x30] sm:$0xff] }
  0xa4   :  { %166 = vst [vmem:[#allocation2 + $0x20] sm:$0x70] %v158_v59  ;;  %134 = vst [vmem:[#allocation2 + $0x20] sm:$0xe] %v126_v60  ;;  %v532_v0 = vpack.c.bf16 %v326_v61, %v322_v58  ;;  %v534_v2 = vpack.c.bf16 %v325_v63, %v321_v62 }
  0xa6   :  { %v226_v3 = vpop.permute.xlu1 %225  ;;  %v184_v4 = vpop.permute.xlu0 %183  ;;  %533 = vmatprep.subr.bf16.mxu1 %v532_v0 }
  0xa7   :  { %v194_v5 = vsel %vm193_vm4, %v184_v4, %v186_v43  ;;  %535 = vmatpush1.bf16.msra.mxu1 %v534_v2  ;;  %v319_v13 = vld [vmem:[#allocation2] sm:$0xff] }
  0xa8   :  { %202 = vst [vmem:[#allocation2 + $0x40] ss:$-28 sps:$4 sm:$0x83] %v194_v5  }
  0xaa   :  { %v230_v6 = vpop.permute.xlu1 %229  ;;  %v228_v7 = vpop.permute.xlu0 %227 }
  0xab   :  { %v235_v8 = vsel %vm233_vm5, %v226_v3, %v228_v7  ;;  %v236_v9 = vsel %vm233_vm5, %v228_v7, %v230_v6 }
  0xac   :  { %243 = vst [vmem:[#allocation2 + $0x48] sm:$0x1c] %v235_v8  ;;  %244 = vst [vmem:[#allocation2 + $0x50] sm:$0x1c] %v236_v9 }
  0xae   :  { %v262_v10 = vpop.permute.xlu1 %261  ;;  %v232_v11 = vpop.permute.xlu0 %231 }
  0xaf   :  { %v237_v12 = vsel %vm233_vm5, %v230_v6, %v232_v11  ;;  %v323_v14 = vld [vmem:[#allocation2 + $0x20] sm:$0xff] }
  0xb0   :  { %245 = vst [vmem:[#allocation2 + $0x58] sm:$0x1c] %v237_v12  ;;  %v526_v15 = vpack.c.bf16 %v323_v14, %v319_v13 }
  0xb2   :  { %v266_v16 = vpop.permute.xlu1 %265  ;;  %v264_v17 = vpop.permute.xlu0 %263  ;;  %527 = vmatpush1.bf16.msra.mxu0 %v526_v15 }
  0xb3   :  { %v271_v18 = vsel %vm269_vm6, %v262_v10, %v264_v17  ;;  %v272_v19 = vsel %vm269_vm6, %v264_v17, %v266_v16 }
  0xb4   :  { %279 = vst [vmem:[#allocation2 + $0x48] sm:$0xe0] %v271_v18  ;;  %280 = vst [vmem:[#allocation2 + $0x50] sm:$0xe0] %v272_v19 }
  0xb6   :  { %v293_v20 = vpop.permute.xlu1 %292  ;;  %v268_v21 = vpop.permute.xlu0 %267 }
  0xb7   :  { %v273_v22 = vsel %vm269_vm6, %v266_v16, %v268_v21 }
  0xb8   :  { %281 = vst [vmem:[#allocation2 + $0x58] sm:$0xe0] %v273_v22 }
  0xba   :  { %v297_v23 = vpop.permute.xlu1 %296  ;;  %v295_v24 = vpop.permute.xlu0 %294 }
  0xbb   :  { %v302_v25 = vsel %vm300_vm7, %v293_v20, %v295_v24  ;;  %v303_v26 = vsel %vm300_vm7, %v295_v24, %v297_v23  ;;  %v328_v35 = vld [vmem:[#allocation2 + $0x48] sm:$0xff]  ;;  %v329_v42 = vld [vmem:[#allocation2 + $0x50] sm:$0xff] }
  0xbc   :  { %310 = vst [vmem:[#allocation2 + $0x68] sm:$0x7] %v302_v25  ;;  %311 = vst [vmem:[#allocation2 + $0x70] sm:$0x7] %v303_v26 }
  0xbe   :  { %v224_v27 = vpop.permute.xlu1 %223  ;;  %v299_v28 = vpop.permute.xlu0 %298 }
  0xbf   :  { %v234_v29 = vsel %vm233_vm5, %v224_v27, %v226_v3  ;;  %v304_v30 = vsel %vm300_vm7, %v297_v23, %v299_v28  ;;  %v330_v39 = vld [vmem:[#allocation2 + $0x58] sm:$0xff] }
  0xc0   :  { %242 = vst [vmem:[#allocation2 + $0x40] sm:$0x1c] %v234_v29  ;;  %312 = vst [vmem:[#allocation2 + $0x78] sm:$0x7] %v304_v30 }
  0xc2   :  { %v291_v31 = vpop.permute.xlu1 %290  ;;  %v260_v32 = vpop.permute.xlu0 %259 }
  0xc3   :  { %v301_v33 = vsel %vm300_vm7, %v291_v31, %v293_v20  ;;  %v270_v34 = vsel %vm269_vm6, %v260_v32, %v262_v10  ;;  %v332_v36 = vld [vmem:[#allocation2 + $0x68] sm:$0xff]  ;;  %v333_v38 = vld [vmem:[#allocation2 + $0x70] sm:$0xff] }
  0xc4   :  { %309 = vst [vmem:[#allocation2 + $0x60] sm:$0x7] %v301_v33  ;;  %278 = vst [vmem:[#allocation2 + $0x40] sm:$0xe0] %v270_v34  ;;  %v528_v37 = vpack.c.bf16 %v332_v36, %v328_v35  ;;  %v538_v43 = vpack.c.bf16 %v333_v38, %v329_v42 }
  0xc6   :  { %529 = vmatprep.subr.bf16.mxu0 %v528_v37 }
  0xc7   :  { %v334_v40 = vld [vmem:[#allocation2 + $0x78] sm:$0xff] }
  0xc8   :  { %v536_v41 = vpack.c.bf16 %v334_v40, %v330_v39 }
  0xca   :  { %537 = vmatprep.subr.bf16.mxu1 %v536_v41 }
  0xcb   :  { %539 = vmatpush1.bf16.msra.mxu1 %v538_v43  ;;  %v327_v44 = vld [vmem:[#allocation2 + $0x40] sm:$0xff] }
  0xcc   :  { %v331_v45 = vld [vmem:[#allocation2 + $0x60] sm:$0xff] }
  0xcd   :  { %v530_v47 = vpack.c.bf16 %v331_v45, %v327_v44 }
  0xce   :  { %522 = vmatmul.mubr.msk.f32.vlgmr.msra.gmra.mrb[0].mxu1 %vm347_vm8, %v317_v46 }
  0xcf   :  { %531 = vmatpush1.bf16.msra.mxu0 %v530_v47  ;;  %501 = vmatprep.mubr.f32.mxu1 %v578_v1 }
  0xd2   :  { %520 = vmatmul.mubr.msk.f32.vlgmr.msra.gmra.mrb[0].mxu0 %vm347_vm8, %v317_v46  ;;  %523 = vmatmul.mubr.msk.f32.gmra.mrb[2].mxu1 %vm347_vm8, %v318_v48 }
  0xd3   :  { %424 = vmatprep.mubr.f32.mxu0 %v578_v1  ;;  %v340_v49 = vpop.permute.xlu0 %339  ;;  %v345_v54 = vpop.permute.xlu1 %344 }
  0xd6   :  { %521 = vmatmul.mubr.msk.f32.gmra.mrb[2].mxu0 %vm347_vm8, %v318_v48 }
 0x1a1   :  { %v497_v50 = vpop.f32.mrb[0].mxu1 }
 0x1a2   :  { %v498_v51 = vadd.f32 %v497_v50, %v340_v49  ;;  %v499_v52 = vpop.f32.mrb[1].mxu1 }
 0x1a3   :  { %v500_v53 = vadd.f32 %v499_v52, %v340_v49 }
 0x1a4   :  { %510 = vst [vmem:[%s789_s3 + $0x10] sm:$0xff] %v498_v51 }
 0x1a5   :  { %v420_v55 = vpop.f32.mrb[0].mxu0  ;;  %511 = vst [vmem:[%s789_s3 + $0x18] sm:$0xff] %v500_v53  ;;  %v503_v1 = vpop.f32.mrb[2].mxu1 }
 0x1a6   :  { %v421_v56 = vadd.f32 %v420_v55, %v340_v49  ;;  %v422_v57 = vpop.f32.mrb[1].mxu0  ;;  %v504_v59 = vadd.f32 %v503_v1, %v345_v54  ;;  %v505_v60 = vpop.f32.mrb[3].mxu1 }
 0x1a7   :  { %v423_v58 = vadd.f32 %v422_v57, %v340_v49  ;;  %v506_v61 = vadd.f32 %v505_v60, %v345_v54 }
 0x1a8   :  { %508 = vst [vmem:[%s789_s3] sm:$0xff] %v421_v56  ;;  %514 = vst [vmem:[%s789_s3 + $0x30] sm:$0xff] %v504_v59 }
 0x1a9   :  { %509 = vst [vmem:[%s789_s3 + $0x8] sm:$0xff] %v423_v58  ;;  %v426_v62 = vpop.f32.mrb[2].mxu0  ;;  %515 = vst [vmem:[%s789_s3 + $0x38] sm:$0xff] %v506_v61 }
 0x1aa   :  { %v427_v63 = vadd.f32 %v426_v62, %v345_v54  ;;  %v428_v0 = vpop.f32.mrb[3].mxu0 }
 0x1ab   :  { %v429_v2 = vadd.f32 %v428_v0, %v345_v54 }
 0x1ac   :  { %512 = vst [vmem:[%s789_s3 + $0x20] sm:$0xff] %v427_v63 }
 0x1ad   :  { %513 = vst [vmem:[%s789_s3 + $0x28] sm:$0xff] %v429_v2 }

</bundles_post_ra>
